<compile_context>
chip_gen: v7x
topology: tpu7x:2x2x1
jax: 0.10.0
libtpu: 0.0.40
codegen_flags: <defaults>
</compile_context>

<pallas_src>
import functools
import math

import jax
import jax.numpy as jnp
from jax.experimental import pallas as pl
from jax.experimental.pallas import tpu as pltpu


def _round_up(x, m):
    return ((x + m - 1) // m) * m


def _adapter_kernel(x_ref, wt_ref, b_ref, s_ref, d_ref, o_ref, acc_ref, *, k_rem):
    """One (M, N, K) grid step of  y = x @ W^T + b + S @ D.

    x_ref  : (tile_m, tile_k)  input tile (last K block may read past in_features)
    wt_ref : (tile_k, tile_n)  frozen W^T tile (zero-padded along K at init)
    b_ref  : (1, tile_n)       bias row tile
    s_ref  : (tile_m, rank)    precomputed block-sum of x
    d_ref  : (rank, tile_n)    adapter matrix disha_D tile
    o_ref  : (tile_m, tile_n)  output tile
    acc_ref: (tile_m, tile_n)  f32 accumulator scratch (persists across K steps)
    k_rem  : static int; in_features % tile_k when K is padded, else 0
    """
    k = pl.program_id(2)
    num_k = pl.num_programs(2)

    @pl.when(k == 0)
    def _init():
        acc_ref[...] = jnp.zeros_like(acc_ref)

    x = x_ref[...]
    if k_rem:
        # Last K block extends past in_features; zero its out-of-bounds columns so
        # the (zero-padded) W^T rows contribute exactly nothing.
        is_last = k == num_k - 1
        col = jax.lax.broadcasted_iota(jnp.int32, x.shape, dimension=1)
        x = jnp.where(jnp.logical_or(jnp.logical_not(is_last), col < k_rem), x, 0)

    # Frozen-linear partial product on the MXU, f32 accumulation.
    acc_ref[...] += jnp.dot(x, wt_ref[...], preferred_element_type=jnp.float32)

    @pl.when(k == num_k - 1)
    def _finalize():
        # Adapter contribution applied once per output tile (not once per K step).
        delta = jnp.dot(s_ref[...], d_ref[...], preferred_element_type=jnp.float32)
        o_ref[...] = (acc_ref[...] + delta + b_ref[...]).astype(o_ref.dtype)


def _chip_config():
    """Pick tile sizes / scoped-VMEM limit from the local TPU generation."""
    try:
        vmem_cap = int(pltpu.get_tpu_info().vmem_capacity_bytes)
    except Exception:
        vmem_cap = None  # unknown: be conservative (v7x-sized VMEM)

    if vmem_cap is not None and vmem_cap >= 128 * 1024 * 1024:
        # v5e / v6e: 128 MiB VMEM -> big tiles, high scoped limit.
        return dict(tile_m=256, tile_n=1024, tile_k=4096,
                    vmem_limit=96 * 1024 * 1024, core_parallel=False)
    # v7x (64 MiB per TensorCore) or unknown: conservative tiles, 32 MiB limit.
    return dict(tile_m=256, tile_n=512, tile_k=2048,
                vmem_limit=32 * 1024 * 1024,
                core_parallel=vmem_cap is not None)


def _choose_k_tiling(in_features, max_tile_k):
    """Returns (tile_k, k_padded).

    Prefers (a) a single full-K block, else (b) the largest 128-aligned divisor of
    in_features <= max_tile_k, else (c) a 128-aligned max tile with W^T zero-padded
    along K (the x tail is masked in-kernel).  Never falls back to a full-K tile.
    """
    if in_features <= max_tile_k:
        return in_features, in_features
    t = (max_tile_k // 128) * 128
    while t >= 128:
        if in_features % t == 0:
            return t, in_features
        t -= 128
    tile_k = (max_tile_k // 128) * 128
    return tile_k, _round_up(in_features, tile_k)


def make_block_diagonal_adapter(w, b, rank):
    """Init-time prep of the frozen nn.Linear; returns forward(x, disha_D).

    w : (out_features, in_features)  frozen PyTorch nn.Linear weight layout
    b : (out_features,)              frozen bias
    """
    w = jnp.asarray(w)
    b = jnp.asarray(b)
    out_features, in_features = w.shape
    if in_features % rank != 0:
        raise ValueError("in_features must be divisible by rank")
    if b.shape != (out_features,):
        raise ValueError("bias shape mismatch")

    cfg = _chip_config()
    tile_k, k_padded = _choose_k_tiling(in_features, cfg["tile_k"])
    k_rem = in_features % tile_k if k_padded != in_features else 0

    # Hoisted, per-call-free frozen-parameter prep (W/b are frozen in the module).
    w_t = w.T                                         # (in_features, out_features)
    if k_padded != in_features:
        w_t = jnp.concatenate(
            [w_t, jnp.zeros((k_padded - in_features, out_features), w_t.dtype)],
            axis=0)
    b_row = b.reshape(1, out_features)

    tile_n = min(cfg["tile_n"], out_features)
    grid_n = pl.cdiv(out_features, tile_n)
    grid_k = k_padded // tile_k

    @jax.jit
    def forward(x, disha_d):
        if x.shape[-1] != in_features:
            raise ValueError("input feature dim mismatch")
        if disha_d.shape != (rank, out_features):
            raise ValueError("disha_D shape mismatch")

        leading = x.shape[:-1]
        m = math.prod(leading) if leading else 1
        x2d = x.reshape(m, in_features)

        # Cheap XLA/VPU block-sum; its S @ D product is fused into the kernel's
        # K-finalize step (once per output tile instead of once per K step).
        s = x2d.reshape(m, in_features // rank, rank).sum(axis=1)

        # Sublane-aligned M tile: 8 rows/vreg for 4-byte, 16 for 2-byte, 32 for 1-byte.
        sub = max(8, 32 // max(1, x2d.dtype.itemsize))
        tile_m = min(cfg["tile_m"], _round_up(m, sub))
        grid_m = pl.cdiv(m, tile_m)

        m_sem = pltpu.PARALLEL
        if cfg["core_parallel"] and grid_m >= 2:
            # v7x: split row tiles across the two TensorCores.
            m_sem = pltpu.CORE_PARALLEL

        kernel = functools.partial(_adapter_kernel, k_rem=k_rem)
        out = pl.pallas_call(
            kernel,
            out_shape=jax.ShapeDtypeStruct((m, out_features), x.dtype),
            grid_spec=pltpu.PrefetchScalarGridSpec(
                num_scalar_prefetch=0,
                grid=(grid_m, grid_n, grid_k),
                in_specs=[
                    pl.BlockSpec((tile_m, tile_k), lambda i, j, k: (i, k)),   # x
                    # TODO(synk): for small-m decode calls on v5e, pl.Buffered(3) on W^T
                    # can hide exposed DMA gaps (budget permitting).
                    pl.BlockSpec((tile_k, tile_n), lambda i, j, k: (k, j)),   # W^T
                    pl.BlockSpec((1, tile_n),      lambda i, j, k: (0, j)),   # bias
                    pl.BlockSpec((tile_m, rank),   lambda i, j, k: (i, 0)),   # S
                    pl.BlockSpec((rank, tile_n),   lambda i, j, k: (0, j)),   # disha_D
                ],
                out_specs=pl.BlockSpec((tile_m, tile_n), lambda i, j, k: (i, j)),
                scratch_shapes=[pltpu.VMEM((tile_m, tile_n), jnp.float32)],
            ),
            compiler_params=pltpu.CompilerParams(
                dimension_semantics=(m_sem, pltpu.PARALLEL, pltpu.ARBITRARY),
                vmem_limit_bytes=cfg["vmem_limit"],
            ),
        )(x2d, w_t, b_row, s, disha_d)

        return out.reshape(*leading, out_features)

    return forward


def _reference_forward(x, w, b, disha_d):
    """Pure-JAX reference mirroring the PyTorch forward."""
    in_features = x.shape[-1]
    rank = disha_d.shape[0]
    original = jnp.einsum("...i,oi->...o", x, w) + b
    s = x.reshape(*x.shape[:-1], in_features // rank, rank).sum(axis=-2)
    return original + s @ disha_d


if __name__ == "__main__":
    # Small shapes consistent with the module: x = (batch, seq, in_features).
    batch, seq = 2, 8
    in_features, out_features, rank = 32, 32, 8

    key = jax.random.PRNGKey(0)
    kx, kw, kb, kd = jax.random.split(key, 4)

    x = jax.random.normal(kx, (batch, seq, in_features), dtype=jnp.float32)
    # Frozen original nn.Linear parameters (deterministic synthetic init).
    w = jax.random.normal(kw, (out_features, in_features), dtype=jnp.float32) * 0.1
    b = jax.random.normal(kb, (out_features,), dtype=jnp.float32) * 0.1
    # The module inits disha_D to zeros; use small deterministic values here so the
    # adapter path is actually exercised numerically.
    disha_d = jax.random.normal(kd, (rank, out_features), dtype=jnp.float32) * 0.05

    forward = make_block_diagonal_adapter(w, b, rank)   # init-time frozen-layer prep
    y = jax.block_until_ready(forward(x, disha_d))

    y_ref = _reference_forward(x, w, b, disha_d)
    assert y.shape == (batch, seq, out_features)
    assert jnp.allclose(y, y_ref, atol=1e-4, rtol=1e-4), "mismatch vs reference"

    print("KERNEL_OK")
</pallas_src>

<mosaic_0001>
module attributes {stable_mosaic.version = 11 : i64} {
  func.func @_adapter_kernel(%arg0: i32, %arg1: i32, %arg2: i32, %arg3: memref<16x32xf32, #tpu.memory_space<vmem>>, %arg4: memref<32x32xf32, #tpu.memory_space<vmem>>, %arg5: memref<1x32xf32, #tpu.memory_space<vmem>>, %arg6: memref<16x8xf32, #tpu.memory_space<vmem>>, %arg7: memref<8x32xf32, #tpu.memory_space<vmem>>, %arg8: memref<16x32xf32, #tpu.memory_space<vmem>>, %arg9: memref<16x32xf32, #tpu.memory_space<vmem>>) attributes {dimension_semantics = [#tpu.dimension_semantics<parallel>, #tpu.dimension_semantics<parallel>, #tpu.dimension_semantics<arbitrary>], iteration_bounds = array<i64: 1, 1, 1>, scalar_prefetch = 0 : i64, scratch_operands = 1 : i64, tpu.core_type = #tpu.core_type<tc>, window_params = [{transform_indices = @transform_0, window_bounds = array<i64: 16, 32>}, {transform_indices = @transform_1, window_bounds = array<i64: 32, 32>}, {transform_indices = @transform_2, window_bounds = array<i64: 1, 32>}, {transform_indices = @transform_3, window_bounds = array<i64: 16, 8>}, {transform_indices = @transform_4, window_bounds = array<i64: 8, 32>}, {transform_indices = @transform_5, window_bounds = array<i64: 16, 32>}]} {
    %c0_i32 = arith.constant 0 : i32
    %0 = arith.cmpi eq, %arg2, %c0_i32 : i32
    %1 = arith.extui %0 : i1 to i32
    %c0_i32_0 = arith.constant 0 : i32
    %2 = arith.cmpi ne, %1, %c0_i32_0 : i32
    scf.if %2 {
      %cst_10 = arith.constant 0.000000e+00 : f32
      %12 = vector.broadcast %cst_10 : f32 to vector<16x32xf32>
      %c0_11 = arith.constant 0 : index
      %c0_12 = arith.constant 0 : index
      %13 = vector.load %arg9[%c0_11, %c0_12] : memref<16x32xf32, #tpu.memory_space<vmem>>, vector<16x32xf32>
      tpu.vector_store %arg9[%c0_11, %c0_12], %12 {strides = array<i32>} : memref<16x32xf32, #tpu.memory_space<vmem>>, vector<16x32xf32>,
    } else {
    }
    %c0 = arith.constant 0 : index
    %c0_1 = arith.constant 0 : index
    %3 = vector.load %arg3[%c0, %c0_1] : memref<16x32xf32, #tpu.memory_space<vmem>>, vector<16x32xf32>
    %c0_2 = arith.constant 0 : index
    %c0_3 = arith.constant 0 : index
    %4 = vector.load %arg9[%c0_2, %c0_3] : memref<16x32xf32, #tpu.memory_space<vmem>>, vector<16x32xf32>
    %c0_4 = arith.constant 0 : index
    %c0_5 = arith.constant 0 : index
    %5 = vector.load %arg4[%c0_4, %c0_5] : memref<32x32xf32, #tpu.memory_space<vmem>>, vector<32x32xf32>
    %cst = arith.constant dense<0.000000e+00> : vector<16x32xf32>
    %6 = tpu.matmul %3, %5, %cst {dimension_numbers = #tpu.dot_dimension_numbers<[1], [0], [0], [1], [0, 0, 1, 1], [], []>} : vector<16x32xf32>, vector<32x32xf32>, vector<16x32xf32> -> vector<16x32xf32>
    %7 = arith.addf %4, %6 : vector<16x32xf32>
    %c0_6 = arith.constant 0 : index
    %c0_7 = arith.constant 0 : index
    %8 = vector.load %arg9[%c0_6, %c0_7] : memref<16x32xf32, #tpu.memory_space<vmem>>, vector<16x32xf32>
    tpu.vector_store %arg9[%c0_6, %c0_7], %7 {strides = array<i32>} : memref<16x32xf32, #tpu.memory_space<vmem>>, vector<16x32xf32>,
    %c0_i32_8 = arith.constant 0 : i32
    %9 = arith.cmpi eq, %arg2, %c0_i32_8 : i32
    %10 = arith.extui %9 : i1 to i32
    %c0_i32_9 = arith.constant 0 : i32
    %11 = arith.cmpi ne, %10, %c0_i32_9 : i32
    scf.if %11 {
      %c0_10 = arith.constant 0 : index
      %c0_11 = arith.constant 0 : index
      %12 = vector.load %arg6[%c0_10, %c0_11] : memref<16x8xf32, #tpu.memory_space<vmem>>, vector<16x8xf32>
      %c0_12 = arith.constant 0 : index
      %c0_13 = arith.constant 0 : index
      %13 = vector.load %arg7[%c0_12, %c0_13] : memref<8x32xf32, #tpu.memory_space<vmem>>, vector<8x32xf32>
      %cst_14 = arith.constant dense<0.000000e+00> : vector<16x32xf32>
      %14 = tpu.matmul %12, %13, %cst_14 {dimension_numbers = #tpu.dot_dimension_numbers<[1], [0], [0], [1], [0, 0, 1, 1], [], []>} : vector<16x8xf32>, vector<8x32xf32>, vector<16x32xf32> -> vector<16x32xf32>
      %c0_15 = arith.constant 0 : index
      %c0_16 = arith.constant 0 : index
      %15 = vector.load %arg9[%c0_15, %c0_16] : memref<16x32xf32, #tpu.memory_space<vmem>>, vector<16x32xf32>
      %16 = arith.addf %15, %14 : vector<16x32xf32>
      %c0_17 = arith.constant 0 : index
      %c0_18 = arith.constant 0 : index
      %17 = vector.load %arg5[%c0_17, %c0_18] : memref<1x32xf32, #tpu.memory_space<vmem>>, vector<1x32xf32>
      %18 = vector.broadcast %17 : vector<1x32xf32> to vector<16x32xf32>
      %19 = arith.addf %16, %18 : vector<16x32xf32>
      %c0_19 = arith.constant 0 : index
      %c0_20 = arith.constant 0 : index
      %20 = vector.load %arg8[%c0_19, %c0_20] : memref<16x32xf32, #tpu.memory_space<vmem>>, vector<16x32xf32>
      tpu.vector_store %arg8[%c0_19, %c0_20], %19 {strides = array<i32>} : memref<16x32xf32, #tpu.memory_space<vmem>>, vector<16x32xf32>,
    } else {
    }
    return
  }
  func.func @transform_0(%arg0: i32, %arg1: i32, %arg2: i32) -> (i32, i32) {
    %c0_i32 = arith.constant 0 : i32
    return %arg0, %arg2 : i32, i32
  }
  func.func @transform_1(%arg0: i32, %arg1: i32, %arg2: i32) -> (i32, i32) {
    %c0_i32 = arith.constant 0 : i32
    return %arg2, %arg1 : i32, i32
  }
  func.func @transform_2(%arg0: i32, %arg1: i32, %arg2: i32) -> (i32, i32) {
    %c0_i32 = arith.constant 0 : i32
    %c0_i32_0 = arith.constant 0 : i32
    return %c0_i32, %arg1 : i32, i32
  }
  func.func @transform_3(%arg0: i32, %arg1: i32, %arg2: i32) -> (i32, i32) {
    %c0_i32 = arith.constant 0 : i32
    %c0_i32_0 = arith.constant 0 : i32
    return %arg0, %c0_i32 : i32, i32
  }
  func.func @transform_4(%arg0: i32, %arg1: i32, %arg2: i32) -> (i32, i32) {
    %c0_i32 = arith.constant 0 : i32
    %c0_i32_0 = arith.constant 0 : i32
    return %c0_i32, %arg1 : i32, i32
  }
  func.func @transform_5(%arg0: i32, %arg1: i32, %arg2: i32) -> (i32, i32) {
    %c0_i32 = arith.constant 0 : i32
    return %arg0, %arg1 : i32, i32
  }
}

</mosaic_0001>

<bundles_post_ra>
// kernel: forward.1
= control target key start
LH: loop header
LB: loop body
LE: loop exit
PB: predicated region body
PF: predicated region fallthrough
CT: control target
= control target key end

     0   :  { %vm25_vm0 = vcmask 261120   ;;  %v307_v6 = vmov 0.0   ;;  %vm128_vm1 = vcmask 64512   ;;  %s391_s0 = inlined_call_operand.vmem [shape: f32[16,32], index: 0, kind: input, shape index: {}]   ;;  %s392_s1 = inlined_call_operand.vmem [shape: f32[32,32], index: 1, kind: input, shape index: {}]   ;;  %s393_s2 = inlined_call_operand.vmem [shape: f32[1,32], index: 2, kind: input, shape index: {}]   ;;  %s394_s3 = inlined_call_operand.vmem [shape: f32[16,8], index: 3, kind: input, shape index: {}]   ;;  %s395_s4 = inlined_call_operand.vmem [shape: f32[8,32], index: 4, kind: input, shape index: {}]   ;;  %s396_s5 = inlined_call_operand.hbm [shape: f32[16,32], index: 5, kind: output, shape index: {}]  }
   0x1   :  { %v32_v0 = vld [vmem:[%s392_s1] sm:$0xff]  ;;  %v33_v1 = vld [vmem:[%s392_s1 + $0x8] sm:$0xff]  ;;  %v34_v2 = vld [vmem:[%s392_s1 + $0x10] sm:$0xff]  ;;  %27 = vst.msk [vmem:[#allocation2 + $0x8] sm:$0xff] %vm25_vm0, %v307_v6 }
   0x2   :  { %v271_v3 = vpack.c.bf16 %v33_v1, %v32_v0  ;;  %v35_v4 = vld [vmem:[%s392_s1 + $0x18] sm:$0xff]  ;;  %v28_v5 = vld [vmem:[%s391_s0] sm:$0xff]  ;;  %26 = vst.msk [vmem:[#allocation2] sm:$0xff] %vm25_vm0, %v307_v6  ;;  %v126_v10 = vld [vmem:[%s394_s3 + $0x8] sm:$0xff] }
   0x3   :  { %v275_v7 = vpack.c.bf16 %v35_v4, %v34_v2  ;;  %263 = vmatprep.mubr.msk.f32.mxu0 %vm25_vm0, %v28_v5  ;;  %v127_v8 = vld [vmem:[%s395_s4] sm:$0xff] }
   0x4   :  { %v125_v9 = vld [vmem:[%s394_s3] sm:$0xff]  ;;  %272 = vmatprep.subr.bf16.mxu0 %v271_v3  ;;  %266 = vmatprep.subr.mxu1 %v127_v8 }
   0x5   :  { %10 = vsyncpa [#allocation4], 0  ;;  %274 = vmatpush3.bf16.msra.mxu0 %v271_v3  ;;  %267 = vmatpush3.msra.mxu1 %v127_v8  ;;  %v29_v11 = vld [vmem:[%s391_s0 + $0x8] sm:$0xff]  ;;  %v245_v21 = vld [vmem:[%s393_s2] ss:$0 sm:$0xff]  ;;  %s308_s0 = smov [#allocation3]  }
   0x6   :  { %276 = vmatprep.subr.bf16.mxu0 %v275_v7  ;;  %268 = vmatprep.mubr.msk.f32.mxu1 %vm128_vm1, %v125_v9  ;;  %s230_s10 = sshll.u32 %s308_s0, 4  ;;  %s231_s10 = int_to_ptr.vmem [resolvable:$true] %s230_s10 }
   0x7   :  { %269 = vmatmul.mubr.msk.f32.vlgmr.msra.gmra.mrb[0].mxu1 %vm128_vm1, %v126_v10  ;;  %s283_s11 = scalar_lea.vmem %s231_s10, 256  ;;  %p288_p1 = scmp.lt.s32.totalorder %s231_s10, %s231_s10 }
   0x8   :  { %v31_v14 = vld [vmem:[#allocation2 + $0x8] sm:$0xff]  ;;  %p284_p0 = scmp.ne.s32.totalorder %s231_s10, %s283_s11  ;;  %p289_p2 = scmp.lt.s32.totalorder %s283_s11, %s283_s11 }
   0x9   :  { %278 = vmatpush3.bf16.msra.mxu0 %v275_v7  ;;  %v30_v15 = vld [vmem:[#allocation2] sm:$0xff] }
   0xa   :  { %p290_p3 = por %p289_p2, %p288_p1 }
   0xc   :  { %264 = vmatmul.mubr.msk.f32.vlgmr.msra.gmra.mrb[0].mxu0 %vm25_vm0, %v29_v11  ;;  %p291_p4 = pnand %p290_p3, %p284_p0 }
  0xda   :  { %v270_v12 = vpop.f32.mrb[0].mxu1 }
  0xdb   :  { %v201_v13 = vpop.f32.mrb[1].mxu1 }
  0xdf   :  { %v265_v16 = vpop.f32.mrb[0].mxu0 }
  0xe0   :  { %v119_v17 = vadd.f32 %v265_v16, %v31_v14  ;;  %v109_v18 = vpop.f32.mrb[1].mxu0 }
  0xe1   :  { %v118_v19 = vadd.f32 %v109_v18, %v30_v15 }
  0xe2   :  { %121 = vst.msk [vmem:[#allocation2 + $0x8] sm:$0xff] %vm25_vm0, %v119_v17 }
  0xe3   :  { %120 = vst.msk [vmem:[#allocation2] sm:$0xff] %vm25_vm0, %v118_v19 }
  0xe9   :  { %v211_v20 = vld [vmem:[#allocation2 + $0x8] sm:$0xff] }
  0xea   :  { %v213_v22 = vadd.f32 %v270_v12, %v211_v20  ;;  %v210_v23 = vld [vmem:[#allocation2] sm:$0xff] }
  0xeb   :  { %v212_v24 = vadd.f32 %v210_v23, %v201_v13 }
  0xec   :  { %v222_v25 = vadd.f32 %v245_v21, %v213_v22 }
  0xed   :  { %v221_v26 = vadd.f32 %v245_v21, %v212_v24 }
  0xee   :  { %224 = vst.msk [vmem:[#allocation3 + $0x8] sm:$0xff] %vm25_vm0, %v222_v25 }
  0xef   :  { %223 = vst.msk [vmem:[#allocation3] sm:$0xff] %vm25_vm0, %v221_v26 }
  0xf0   :  { %294 = shalt.err (!%p291_p4)
}
  0xf1   :  { %s295_s13 = scalar_lea.hbm %s396_s5, 256 }
  0xf2   :  { %p296_p5 = scmp.ne.s32.totalorder %s396_s5, %s295_s13  ;;  %p299_p6 = scmp.lt.u32.totalorder %s295_s13, %s396_s5 }
  0xf4   :  { %p301_p7 = pnand %p299_p6, %p296_p5 }
  0xf6   :  { %304 = shalt.err (!%p301_p7)
}
  0xf7   :  { %s309_s18 = smov 128   ;;  %s310_s19 = smov 8  }
  0xf8   :  { %236 = dma.vmem_to_hbm [thread:$0]  %s231_s10, 256, %s396_s5, [#allocation4], %s309_s18, %s309_s18, %s310_s19  }
  0xf9   :  { %305 = dma.done.wait [#allocation4], 256  }
  0xfa   :  { %306 = vsyncadd [#allocation4], 4294967040 }
  0xfb   :  { %240 = vsyncpa [#allocation4], 1 }

</bundles_post_ra>
